<compile_context>
chip_gen: v6e
topology: v6e:2x2x1
jax: 0.10.0
libtpu: 0.0.40
codegen_flags: <defaults>
</compile_context>

<pallas_src>
import jax
import jax.numpy as jnp
from jax.experimental import pallas as pl
from jax.experimental.pallas import tpu as pltpu


def _round_up(a, b):
    return -(-a // b) * b


def _cdiv(a, b):
    return -(-a // b)


def _toeplitz_same(taps_f32, td, dtype):
    """(td, td) same-tile band: out[t] += x[s] * taps[K-1-(t-s)], 0<=t-s<=K-1."""
    K = taps_f32.shape[0]
    s = jnp.arange(td, dtype=jnp.int32)[:, None]
    t = jnp.arange(td, dtype=jnp.int32)[None, :]
    delta = t - s
    valid = (delta >= 0) & (delta <= K - 1)
    k = jnp.clip((K - 1) - delta, 0, K - 1)
    return jnp.where(valid, jnp.take(taps_f32, k), 0.0).astype(dtype)


def _toeplitz_halo(taps_f32, kp, td, dtype):
    """(kp, td) previous-tile band; halo row h = global column tile_start-kp+h."""
    K = taps_f32.shape[0]
    h = jnp.arange(kp, dtype=jnp.int32)[:, None]
    t = jnp.arange(td, dtype=jnp.int32)[None, :]
    delta = t - h + kp
    valid = (delta >= 1) & (delta <= K - 1)
    k = jnp.clip((K - 1) - delta, 0, K - 1)
    return jnp.where(valid, jnp.take(taps_f32, k), 0.0).astype(dtype)


def trend_ext(x, weight, bias, kernel_size, *, row_tile=512, lane_tile=256,
              compute_dtype=jnp.bfloat16):
    """Causal depthwise moving-average conv (Trend_ext.forward).

    x: (B, C, D); weight: (C, 1, K) depthwise conv weight; bias: (C,).
    """
    B, C, D = x.shape
    K = int(kernel_size)
    R = B * C
    out_dtype = x.dtype

    # Taps are channel-shared in Trend_ext (softmax of ones == 1/K per tap).
    taps = weight.reshape(C, K)[0].astype(jnp.float32)

    # ---- lane (D) tiling: K-aware, multiple of 128, near-divides D ---------
    Kp = _round_up(max(K - 1, 1), 128)          # halo width (>= K-1)
    D128 = _round_up(D, 128)
    if D128 <= max(2 * lane_tile, Kp):          # whole D in one lane-dense tile
        td, n_dt = D128, 1
    else:
        base = max(lane_tile, Kp)
        n_dt = _cdiv(D, base)
        td = max(_round_up(_cdiv(D, n_dt), 128), Kp)   # spread evenly, >= Kp
        n_dt = _cdiv(D, td)
    Dp = n_dt * td

    # ---- row tiling: multiple of 8; >=2 row blocks when possible (v7x) -----
    R8 = _round_up(R, 8)
    if R8 >= 16:
        tr = min(row_tile, max(8, (R8 // 2) // 8 * 8))
    else:
        tr = R8
    Rp = _round_up(R, tr)
    n_rt = Rp // tr

    # ---- host-side layout (single pass; pad only when ragged) --------------
    x2 = x.reshape(R, D)
    if (Rp, Dp) != (R, D):
        x2 = jnp.pad(x2, ((0, Rp - R), (0, Dp - D)))   # zero rows/cols are inert

    # Per-row bias (channel bias broadcast over batch), fused in-kernel.
    bias_rows = jnp.tile(bias.astype(jnp.float32).reshape(1, C), (B, 1)).reshape(R, 1)
    if Rp != R:
        bias_rows = jnp.pad(bias_rows, ((0, Rp - R), (0, 0)))

    # Toeplitz matrices are tiny (K-aware td) and constant-fold under jit when
    # the weights are constants.
    t_cur = _toeplitz_same(taps, td, compute_dtype)

    # ---- VMEM budget from the actual tile footprint ------------------------
    b_in = jnp.dtype(x2.dtype).itemsize
    b_cd = jnp.dtype(compute_dtype).itemsize
    b_out = jnp.dtype(out_dtype).itemsize
    fp = 2 * tr * td * b_in + 2 * td * td * b_cd + 2 * tr * 4 + 2 * tr * td * b_out
    if n_dt > 1:
        fp += 2 * Kp * td * b_cd + tr * Kp * b_cd
    vmem_limit = int(min(max(fp + (4 << 20), 32 << 20), 128 << 20))

    # ---- kernels (close over td/Kp/compute_dtype) ---------------------------
    def kernel_single(xc_ref, tc_ref, b_ref, o_ref):
        xc = xc_ref[...].astype(compute_dtype)          # cast in VMEM, MXU bf16
        acc = jnp.dot(xc, tc_ref[...], preferred_element_type=jnp.float32)
        o_ref[...] = (acc + b_ref[...]).astype(o_ref.dtype)

    def kernel_multi(xc_ref, tc_ref, tp_ref, b_ref, o_ref, hscr_ref):
        j = pl.program_id(1)
        xc = xc_ref[...].astype(compute_dtype)
        acc = jnp.dot(xc, tc_ref[...], preferred_element_type=jnp.float32)

        @pl.when(j == 0)
        def _():
            # Everything left of the first D-tile is causal zero padding.
            o_ref[...] = (acc + b_ref[...]).astype(o_ref.dtype)

        @pl.when(j > 0)
        def _():
            halo = jnp.dot(hscr_ref[...], tp_ref[...],
                           preferred_element_type=jnp.float32)
            o_ref[...] = (acc + halo + b_ref[...]).astype(o_ref.dtype)

        # Carry the causal halo (last Kp columns of this tile) for the next
        # D-tile in VMEM scratch -- no duplicate HBM read of the input.
        hscr_ref[...] = xc[:, td - Kp:]

    compiler_params_1d = pltpu.CompilerParams(
        dimension_semantics=("parallel",), vmem_limit_bytes=vmem_limit)
    compiler_params_2d = pltpu.CompilerParams(
        dimension_semantics=("parallel", "arbitrary"), vmem_limit_bytes=vmem_limit)

    if n_dt == 1:
        out = pl.pallas_call(
            kernel_single,
            out_shape=jax.ShapeDtypeStruct((Rp, Dp), out_dtype),
            grid_spec=pltpu.PrefetchScalarGridSpec(
                num_scalar_prefetch=0,
                grid=(n_rt,),
                in_specs=[
                    pl.BlockSpec((tr, td), lambda i: (i, 0)),
                    pl.BlockSpec((td, td), lambda i: (0, 0)),
                    pl.BlockSpec((tr, 1), lambda i: (i, 0)),
                ],
                out_specs=pl.BlockSpec((tr, td), lambda i: (i, 0)),
            ),
            compiler_params=compiler_params_1d,
        )(x2, t_cur, bias_rows)
    else:
        t_prev = _toeplitz_halo(taps, Kp, td, compute_dtype)
        out = pl.pallas_call(
            kernel_multi,
            out_shape=jax.ShapeDtypeStruct((Rp, Dp), out_dtype),
            grid_spec=pltpu.PrefetchScalarGridSpec(
                num_scalar_prefetch=0,
                grid=(n_rt, n_dt),
                in_specs=[
                    pl.BlockSpec((tr, td), lambda i, j: (i, j)),   # x (current tile)
                    pl.BlockSpec((td, td), lambda i, j: (0, 0)),   # T_cur (resident)
                    pl.BlockSpec((Kp, td), lambda i, j: (0, 0)),   # T_prev (resident)
                    pl.BlockSpec((tr, 1), lambda i, j: (i, 0)),    # per-row bias
                ],
                out_specs=pl.BlockSpec((tr, td), lambda i, j: (i, j)),
                scratch_shapes=[pltpu.VMEM((tr, Kp), compute_dtype)],
            ),
            compiler_params=compiler_params_2d,
        )(x2, t_cur, t_prev, bias_rows)

    # Un-pad slice is a no-op when R, D already divide the tiles.
    out = out[:R, :D].reshape(B, C, D)
    # Dropout(p=0.0) is the identity: nothing to do.
    return out


def _reference(x, weight, bias, K):
    B, C, D = x.shape
    xp = jnp.concatenate([jnp.zeros((B, C, K - 1), x.dtype), x], axis=-1)
    w2 = weight.reshape(C, K)
    ref = sum(xp[:, :, k:k + D] * w2[None, :, k:k + 1] for k in range(K))
    return ref + bias[None, :, None]


if __name__ == "__main__":
    key = jax.random.PRNGKey(0)
    k0, k1, k2 = jax.random.split(key, 3)

    # --- single-D-tile path ---------------------------------------------------
    B, C, D, K = 2, 4, 16, 8   # module default kernel_size is 256; small for test
    x = jax.random.normal(k0, (B, C, D), dtype=jnp.float32)
    weight = jax.nn.softmax(jnp.ones((C, 1, K), jnp.float32), axis=-1)
    bias = jnp.zeros((C,), jnp.float32)
    ref = _reference(x, weight, bias, K)

    out_bf16 = jax.block_until_ready(trend_ext(x, weight, bias, K))
    assert out_bf16.shape == (B, C, D)
    assert jnp.allclose(out_bf16, ref, atol=3e-2, rtol=3e-2)

    out_f32 = jax.block_until_ready(
        trend_ext(x, weight, bias, K, compute_dtype=jnp.float32))
    assert jnp.allclose(out_f32, ref, atol=1e-5, rtol=1e-5)

    # --- multi-D-tile path (halo carry, ragged R/D padding, fused bias) -------
    B2, C2, D2, K2 = 3, 6, 300, 8
    x2 = jax.random.normal(k1, (B2, C2, D2), dtype=jnp.float32)
    weight2 = jax.nn.softmax(jnp.ones((C2, 1, K2), jnp.float32), axis=-1)
    bias2 = 0.1 * jax.random.normal(k2, (C2,), jnp.float32)
    ref2 = _reference(x2, weight2, bias2, K2)

    out2 = jax.block_until_ready(
        trend_ext(x2, weight2, bias2, K2, lane_tile=128))
    assert out2.shape == (B2, C2, D2)
    assert jnp.allclose(out2, ref2, atol=3e-2, rtol=3e-2)

    out2_f32 = jax.block_until_ready(
        trend_ext(x2, weight2, bias2, K2, lane_tile=128,
                  compute_dtype=jnp.float32))
    assert jnp.allclose(out2_f32, ref2, atol=1e-5, rtol=1e-5)

    print("KERNEL_OK")
</pallas_src>

<mosaic_0001>
module attributes {stable_mosaic.version = 11 : i64} {
  func.func @kernel_single(%arg0: i32, %arg1: memref<8x128xf32, #tpu.memory_space<vmem>>, %arg2: memref<128x128xbf16, #tpu.memory_space<vmem>>, %arg3: memref<8x1xf32, #tpu.memory_space<vmem>>, %arg4: memref<8x128xf32, #tpu.memory_space<vmem>>) attributes {dimension_semantics = [#tpu.dimension_semantics<parallel>], iteration_bounds = array<i64: 1>, scalar_prefetch = 0 : i64, scratch_operands = 0 : i64, tpu.core_type = #tpu.core_type<tc>, window_params = [{transform_indices = @transform_0, window_bounds = array<i64: 8, 128>}, {pipeline_mode = #tpu.pipeline_mode<synchronous>, transform_indices = @transform_1, window_bounds = array<i64: 128, 128>}, {transform_indices = @transform_2, window_bounds = array<i64: 8, 1>}, {transform_indices = @transform_3, window_bounds = array<i64: 8, 128>}]} {
    %c0 = arith.constant 0 : index
    %c0_0 = arith.constant 0 : index
    %0 = vector.load %arg1[%c0, %c0_0] : memref<8x128xf32, #tpu.memory_space<vmem>>, vector<8x128xf32>
    %1 = arith.truncf %0 : vector<8x128xf32> to vector<8x128xbf16>
    %c0_1 = arith.constant 0 : index
    %c0_2 = arith.constant 0 : index
    %2 = vector.load %arg2[%c0_1, %c0_2] : memref<128x128xbf16, #tpu.memory_space<vmem>>, vector<128x128xbf16>
    %cst = arith.constant dense<0.000000e+00> : vector<8x128xf32>
    %3 = tpu.matmul %1, %2, %cst {dimension_numbers = #tpu.dot_dimension_numbers<[1], [0], [0], [1], [0, 0, 1, 1], [], []>} : vector<8x128xbf16>, vector<128x128xbf16>, vector<8x128xf32> -> vector<8x128xf32>
    %c0_3 = arith.constant 0 : index
    %c0_4 = arith.constant 0 : index
    %4 = vector.load %arg3[%c0_3, %c0_4] : memref<8x1xf32, #tpu.memory_space<vmem>>, vector<8x1xf32>
    %5 = vector.broadcast %4 : vector<8x1xf32> to vector<8x128xf32>
    %6 = arith.addf %3, %5 : vector<8x128xf32>
    %c0_5 = arith.constant 0 : index
    %c0_6 = arith.constant 0 : index
    %7 = vector.load %arg4[%c0_5, %c0_6] : memref<8x128xf32, #tpu.memory_space<vmem>>, vector<8x128xf32>
    tpu.vector_store %arg4[%c0_5, %c0_6], %6 {strides = array<i32>} : memref<8x128xf32, #tpu.memory_space<vmem>>, vector<8x128xf32>,
    return
  }
  func.func @transform_0(%arg0: i32) -> (i32, i32) {
    %c0_i32 = arith.constant 0 : i32
    %c0_i32_0 = arith.constant 0 : i32
    return %arg0, %c0_i32 : i32, i32
  }
  func.func @transform_1(%arg0: i32) -> (i32, i32) {
    %c0_i32 = arith.constant 0 : i32
    %c0_i32_0 = arith.constant 0 : i32
    %c0_i32_1 = arith.constant 0 : i32
    return %c0_i32, %c0_i32_0 : i32, i32
  }
  func.func @transform_2(%arg0: i32) -> (i32, i32) {
    %c0_i32 = arith.constant 0 : i32
    %c0_i32_0 = arith.constant 0 : i32
    return %arg0, %c0_i32 : i32, i32
  }
  func.func @transform_3(%arg0: i32) -> (i32, i32) {
    %c0_i32 = arith.constant 0 : i32
    %c0_i32_0 = arith.constant 0 : i32
    return %arg0, %c0_i32 : i32, i32
  }
}

</mosaic_0001>

<bundles_post_ra>
// kernel: tpu_custom_call.1
= control target key start
LH: loop header
LB: loop body
LE: loop exit
PB: predicated region body
PF: predicated region fallthrough
CT: control target
= control target key end

     0   :  { %8 = vsyncpa [#allocation3], 0  ;;  %s294_s0 = inlined_call_operand.vmem [shape: f32[8,128], index: 0, kind: input, shape index: {}]   ;;  %s295_s1 = inlined_call_operand.hbm [shape: bf16[128,128], index: 1, kind: input, shape index: {}]   ;;  %s296_s2 = inlined_call_operand.vmem [shape: f32[8,1], index: 2, kind: input, shape index: {}]   ;;  %s297_s3 = inlined_call_operand.hbm [shape: f32[8,128], index: 3, kind: output, shape index: {}]  }
   0x1   :  { %9 = vsyncpa [#allocation4], 0  ;;  %s255_s12 = smov [#allocation2]  }
   0x2   :  { %s17_s13 = sshll.u32 %s255_s12, 4  ;;  %s18_s13 = int_to_ptr.vmem [resolvable:$true] %s17_s13 }
   0x3   :  { %s219_s14 = scalar_lea.vmem %s18_s13, 1024  ;;  %p224_p1 = scmp.lt.s32.totalorder %s18_s13, %s18_s13 }
   0x4   :  { %p220_p0 = scmp.ne.s32.totalorder %s18_s13, %s219_s14  ;;  %p225_p2 = scmp.lt.s32.totalorder %s219_s14, %s219_s14 }
   0x6   :  { %p226_p3 = por %p225_p2, %p224_p1 }
   0x8   :  { %p227_p4 = pnand %p226_p3, %p220_p0 }
   0xa   :  { %230 = shalt.err (!%p227_p4)
}
   0xb   :  { %s256_s15 = smov 64   ;;  %s257_s16 = smov 4  }
   0xc   :  { %23 = dma.hbm_to_vmem [thread:$0]  %s295_s1, 1024, %s18_s13, [#allocation3], %s256_s15, %s256_s15, %s257_s16  }
   0xd   :  { %251 = dma.done.wait [#allocation3], 1024  }
   0xe   :  { %252 = vsyncadd [#allocation3], 4294966272  ;;  %v258_v0 = vmov 0.0   ;;  %vm259_vm0 = vmmov 0   ;;  %v260_v1 = vmov 0   ;;  %v203_v2 = vld [vmem:[#allocation2 + $0x38] sm:$0xff]  }
   0xf   :  { %175 = vmatprep.subr.bf16.mxu0 %v258_v0  ;;  %191 = vmatprep.mubr.msk.bf16.mxu0 %vm259_vm0, %v258_v0  ;;  %v204_v3 = vld [vmem:[#allocation2 + $0x30] sm:$0xff]   ;;  %v205_v4 = vld [vmem:[#allocation2 + $0x28] sm:$0xff]   ;;  %v48_v5 = vld [vmem:[%s296_s2] sm:$0xff]  ;;  %s261_s2 = smov [#allocation5]  }
  0x10   :  { %202 = vset.pattern.permute.xlu0 %v260_v1  ;;  %176 = vmatpush3.bf16.msra.mxu0 %v203_v2  ;;  %v206_v6 = vld [vmem:[#allocation2 + $0x20] sm:$0xff]   ;;  %v207_v7 = vld [vmem:[#allocation2 + $0x18] sm:$0xff]   ;;  %v208_v8 = vld [vmem:[#allocation2 + $0x10] sm:$0xff]   ;;  %s149_s22 = sshll.u32 %s261_s2, 4  ;;  %s150_s22 = int_to_ptr.vmem [resolvable:$true] %s149_s22 }
  0x11   :  { %177 = vmatprep.subr.bf16.mxu0 %v258_v0  ;;  %51 = vperm.xlu0 %202, %v48_v5   ;;  %v209_v9 = vld [vmem:[#allocation2 + $0x8] sm:$0xff]   ;;  %v210_v10 = vld [vmem:[#allocation2] sm:$0xff]   ;;  %s231_s23 = scalar_lea.vmem %s150_s22, 128  ;;  %p236_p6 = scmp.lt.s32.totalorder %s150_s22, %s150_s22 }
  0x12   :  { %v30_v11 = vld [vmem:[%s294_s0] sm:$0xff]  ;;  %p232_p5 = scmp.ne.s32.totalorder %s150_s22, %s231_s23  ;;  %p237_p7 = scmp.lt.s32.totalorder %s231_s23, %s231_s23 }
  0x13   :  { %v31_v12 = vpack.c.bf16 %v30_v11, %v30_v11 }
  0x14   :  { %178 = vmatpush3.bf16.msra.mxu0 %v204_v3  ;;  %p238_p8 = por %p237_p7, %p236_p6 }
  0x15   :  { %179 = vmatprep.subr.bf16.mxu0 %v258_v0 }
  0x16   :  { %p239_p9 = pnand %p238_p8, %p232_p5 }
  0x18   :  { %180 = vmatpush3.bf16.msra.mxu0 %v205_v4 }
  0x19   :  { %181 = vmatprep.subr.bf16.mxu0 %v258_v0 }
  0x1c   :  { %182 = vmatpush3.bf16.msra.mxu0 %v206_v6 }
  0x1d   :  { %183 = vmatprep.subr.bf16.mxu0 %v258_v0 }
  0x20   :  { %184 = vmatpush3.bf16.msra.mxu0 %v207_v7 }
  0x21   :  { %185 = vmatprep.subr.bf16.mxu0 %v258_v0 }
  0x24   :  { %186 = vmatpush3.bf16.msra.mxu0 %v208_v8 }
  0x25   :  { %187 = vmatprep.subr.bf16.mxu0 %v258_v0 }
  0x28   :  { %188 = vmatpush3.bf16.msra.mxu0 %v209_v9 }
  0x29   :  { %189 = vmatprep.subr.bf16.mxu0 %v258_v0 }
  0x2c   :  { %190 = vmatpush3.bf16.msra.mxu0 %v210_v10 }
  0x2f   :  { %192 = vmatmul.mubr.bf16.vlgmr.msra.gmra.mxu0 %v31_v12 }
  0x8c   :  { %v52_v13 = vpop.permute.xlu0 %51 }
  0xef   :  { %v136_v14 = vpop.f32.mrf.mxu0 }
  0xf0   :  { %v137_v15 = vadd.f32 %v136_v14, %v52_v13 }
  0xf1   :  { %v193_v16 = vpop.f32.mrf.mxu0 }
  0xf2   :  { %142 = vst [vmem:[#allocation5] sm:$0xff] %v137_v15 }
  0xf3   :  { %v139_v17 = vpop.f32.mrf.mxu0 }
  0xf4   :  { %242 = shalt.err (!%p239_p9)
}
  0xf5   :  { %152 = dma.vmem_to_hbm [thread:$0]  %s150_s22, 128, %s297_s3, [#allocation4]   ;;  %v194_v18 = vpop.f32.mrf.mxu0 }
  0xf6   :  { %253 = dma.done.wait [#allocation4], 128  }
  0xf7   :  { %254 = vsyncadd [#allocation4], 4294967168 }
  0xf8   :  { %156 = vsyncpa [#allocation3], 1 }
  0xf9   :  { %157 = vsyncpa [#allocation4], 1 }

</bundles_post_ra>
